<compile_context>
chip_gen: v7x
topology: tpu7x:2x2x1
jax: 0.10.0
libtpu: 0.0.40
codegen_flags: <defaults>
</compile_context>

<pallas_src>
import jax
import jax.numpy as jnp
from jax import lax
from jax.experimental import pallas as pl
from jax.experimental.pallas import tpu as pltpu

# Scoped-VMEM ceiling: large tiles want more than the 32 MiB default scoped limit but
# must stay under v7x's 64 MiB physical VMEM; 48 MiB is safe on v5e / v6e / v7x.
_VMEM_LIMIT_BYTES = 48 * 1024 * 1024


# --------------------------------------------------------------------------- #
# Kernel 1: fused QKV projection (runs exactly once over the sequence).
# --------------------------------------------------------------------------- #
def _qkv_proj_kernel(x_ref, w_ref, q_ref, k_ref, v_ref):
    # x_ref: (1, tm, C)   w_ref: (C, 3H)   q/k/v_ref: (1, tm, H)
    H = q_ref.shape[-1]
    C = x_ref.shape[-1]
    xw = jnp.dot(x_ref[0].astype(w_ref.dtype), w_ref[...],
                 preferred_element_type=jnp.float32)            # (tm, 3H), f32 acc
    # Fold 1/sqrt(C) into q: -inf stays -inf under the later causal mask, so the
    # PyTorch "mask then divide" ordering is preserved exactly.
    scale = 1.0 / jnp.sqrt(jnp.float32(C))
    q_ref[0] = (xw[:, :H] * scale).astype(q_ref.dtype)
    k_ref[0] = xw[:, H:2 * H].astype(k_ref.dtype)
    v_ref[0] = xw[:, 2 * H:].astype(v_ref.dtype)


# --------------------------------------------------------------------------- #
# Kernel 2: flash attention over a flattened lower-triangle block schedule.
# --------------------------------------------------------------------------- #
def _flash_attn_kernel(qi_map_ref, ki_map_ref, q_ref, k_ref, v_ref, o_ref,
                       m_s, l_s, acc_s):
    # Scalar-prefetch refs (SMEM): (q-tile, kv-tile) coordinates of this grid step.
    step = pl.program_id(1)
    qi = qi_map_ref[step]
    ki = ki_map_ref[step]

    tq = q_ref.shape[1]
    tk = k_ref.shape[1]
    dt = q_ref.dtype          # MXU operand dtype (bf16 fast path / f32 exact path)

    @pl.when(ki == 0)
    def _init():
        m_s[...] = jnp.full(m_s.shape, -jnp.inf, dtype=jnp.float32)
        l_s[...] = jnp.zeros(l_s.shape, dtype=jnp.float32)
        acc_s[...] = jnp.zeros(acc_s.shape, dtype=jnp.float32)

    # scores = q @ k^T (contract H against H, no explicit transpose); f32 accumulate.
    scores = lax.dot_general(q_ref[0], k_ref[0],
                             dimension_numbers=(((1,), (1,)), ((), ())),
                             preferred_element_type=jnp.float32)   # (tq, tk)

    def _online_softmax_update(s):
        m_prev = m_s[...]
        m_new = jnp.maximum(m_prev, jnp.max(s, axis=-1, keepdims=True))
        alpha = jnp.exp(m_prev - m_new)
        # exp in the operand dtype: bf16 EUP path on v6e/v7x, and p feeds the PV
        # matmul directly with no extra cast.  l and acc stay f32.
        p = jnp.exp((s - m_new).astype(dt))
        l_s[...] = alpha * l_s[...] + jnp.sum(p.astype(jnp.float32), axis=-1,
                                              keepdims=True)
        acc_s[...] = alpha * acc_s[...] + jnp.dot(
            p, v_ref[0], preferred_element_type=jnp.float32)
        m_s[...] = m_new

    @pl.when(ki < qi)
    def _off_diagonal():
        # Fully visible block: no mask work at all (saves the iota/compare/select
        # VPU ops on the majority of steps).
        _online_softmax_update(scores)

    @pl.when(ki == qi)
    def _diagonal_and_finalize():
        # Diagonal block: causal mask with purely local iotas (valid because tq == tk
        # and the global row/col offsets are both qi * tile).  It is also the last kv
        # block of this q tile in the lower-triangle schedule, so normalize & store.
        row = lax.broadcasted_iota(jnp.int32, (tq, tk), 0)
        col = lax.broadcasted_iota(jnp.int32, (tq, tk), 1)
        _online_softmax_update(jnp.where(col > row, -jnp.inf, scores))
        # TODO(synk): nn.Dropout(p=0.1) on the attention weights is eval-mode
        # identity here; training mode would use pltpu.prng_seed/prng_random_bits.
        o_ref[0] = (acc_s[...] / l_s[...]).astype(o_ref.dtype)    # exact divide


# --------------------------------------------------------------------------- #
# Wrapper
# --------------------------------------------------------------------------- #
def _round_up(n, m):
    return ((n + m - 1) // m) * m


def _pick_tile(T, max_tile):
    """Tile along T: a multiple of 16 (bf16 sublane packing), at most max_tile."""
    return min(_round_up(max_tile, 16), _round_up(T, 16))


def attention_head(x, wq, wk, wv, *, max_tile=512, mxu_dtype=None):
    """Causal single-head attention (eval mode).

    x: (B, T, C); wq/wk/wv: (C, H) (the transposed nn.Linear weights). -> (B, T, H).
    """
    B, T, C = x.shape
    H = wq.shape[1]
    out_dtype = x.dtype
    if mxu_dtype is None:
        # f32 inputs: bf16 MXU operands with f32 accumulation (native fast MXU path
        # on every generation).  Pass mxu_dtype=jnp.float32 for exact parity.
        mxu_dtype = jnp.bfloat16 if x.dtype == jnp.float32 else x.dtype

    tile = _pick_tile(T, max_tile)
    T_pad = _round_up(T, tile)
    nq = T_pad // tile
    if T_pad != T:
        # Padded keys only appear in the masked region of the diagonal block; padded
        # query rows are sliced away below.  Tiling never degenerates to (T, T).
        x = jnp.pad(x, ((0, 0), (0, T_pad - T), (0, 0)))

    # Fused (C, 3H) projection weight -> one MXU pass / one resident weight tile.
    w_qkv = jnp.concatenate([wq, wk, wv], axis=1).astype(mxu_dtype)

    q, k, v = pl.pallas_call(
        _qkv_proj_kernel,
        out_shape=(
            jax.ShapeDtypeStruct((B, T_pad, H), mxu_dtype),
            jax.ShapeDtypeStruct((B, T_pad, H), mxu_dtype),
            jax.ShapeDtypeStruct((B, T_pad, H), mxu_dtype),
        ),
        grid_spec=pltpu.PrefetchScalarGridSpec(
            num_scalar_prefetch=0,
            grid=(B, nq),
            in_specs=[
                pl.BlockSpec((1, tile, C), lambda b, i: (b, i, 0)),
                pl.BlockSpec((C, 3 * H), lambda b, i: (0, 0)),   # resident weight
            ],
            out_specs=[
                pl.BlockSpec((1, tile, H), lambda b, i: (b, i, 0)),
                pl.BlockSpec((1, tile, H), lambda b, i: (b, i, 0)),
                pl.BlockSpec((1, tile, H), lambda b, i: (b, i, 0)),
            ],
        ),
        compiler_params=pltpu.CompilerParams(
            dimension_semantics=("parallel", "parallel"),
            vmem_limit_bytes=_VMEM_LIMIT_BYTES),
    )(x, w_qkv)

    # Flattened lower-triangle schedule: only (qi, ki <= qi) blocks exist as grid
    # steps, so fully-masked upper-triangle steps pay no per-step overhead at all.
    qi_steps, ki_steps = [], []
    for q_idx in range(nq):
        for k_idx in range(q_idx + 1):
            qi_steps.append(q_idx)
            ki_steps.append(k_idx)
    qi_map = jnp.asarray(qi_steps, dtype=jnp.int32)
    ki_map = jnp.asarray(ki_steps, dtype=jnp.int32)
    n_steps = len(qi_steps)

    out = pl.pallas_call(
        _flash_attn_kernel,
        out_shape=jax.ShapeDtypeStruct((B, T_pad, H), out_dtype),
        grid_spec=pltpu.PrefetchScalarGridSpec(
            num_scalar_prefetch=2,      # qi_map, ki_map -> SMEM, drive the index_maps
            grid=(B, n_steps),
            in_specs=[
                pl.BlockSpec((1, tile, H), lambda b, s, qm, km: (b, qm[s], 0)),
                pl.BlockSpec((1, tile, H), lambda b, s, qm, km: (b, km[s], 0)),
                pl.BlockSpec((1, tile, H), lambda b, s, qm, km: (b, km[s], 0)),
            ],
            out_specs=pl.BlockSpec((1, tile, H), lambda b, s, qm, km: (b, qm[s], 0)),
            scratch_shapes=[
                pltpu.VMEM((tile, 1), jnp.float32),   # running max   m
                pltpu.VMEM((tile, 1), jnp.float32),   # running denom l
                pltpu.VMEM((tile, H), jnp.float32),   # f32 output accumulator
            ],
        ),
        # Batch axis is "parallel" (keeps both v7x TensorCores busy when B is even);
        # the triangular-step axis carries the online-softmax state -> "arbitrary".
        # TODO(synk): for B == 1 on v7x, interleave q tiles over a parallel axis so
        # both cores get an equal share of lower-triangle blocks.
        compiler_params=pltpu.CompilerParams(
            dimension_semantics=("parallel", "arbitrary"),
            vmem_limit_bytes=_VMEM_LIMIT_BYTES),
    )(qi_map, ki_map, q, k, v)

    return out[:, :T, :] if T_pad != T else out


def reference(x, wq, wk, wv):
    """Pure-JAX reference matching the PyTorch forward (eval mode), f32 matmuls."""
    B, T, C = x.shape
    with jax.default_matmul_precision("highest"):
        q = x @ wq
        k = x @ wk
        v = x @ wv
        w = q @ jnp.swapaxes(k, 1, 2)
        mask = jnp.tril(jnp.ones((T, T), dtype=bool))
        w = jnp.where(mask, w, -jnp.inf)
        w = w / jnp.sqrt(jnp.float32(C))
        w = jax.nn.softmax(w, axis=-1)
        return w @ v


if __name__ == "__main__":
    # Shapes consistent with the module: embed_size C=32, head_size H=16, B=2.
    # T=56 is deliberately not a multiple of the tile so the padding path runs.
    B, T, C, H = 2, 56, 32, 16
    key = jax.random.PRNGKey(0)
    kx, kq, kk, kv_ = jax.random.split(key, 4)

    x = jax.random.normal(kx, (B, T, C), dtype=jnp.float32)
    # Deterministic "linear layer" weights, stored as (C, H) = transposed nn.Linear.
    wq = jax.random.normal(kq, (C, H), dtype=jnp.float32) * 0.1
    wk = jax.random.normal(kk, (C, H), dtype=jnp.float32) * 0.1
    wv = jax.random.normal(kv_, (C, H), dtype=jnp.float32) * 0.1

    ref = reference(x, wq, wk, wv)

    # Default fast path: bf16 MXU operands / bf16 exp with f32 accumulation.
    # max_tile=16 forces nq=4 -> 10 lower-triangle steps per batch, exercising the
    # scalar-prefetched triangular schedule, diagonal-only masking, online-softmax
    # carry across kv blocks, and T-padding (56 -> 64).
    out = attention_head(x, wq, wk, wv, max_tile=16)
    out = jax.block_until_ready(out)
    assert out.shape == (B, T, H)
    assert jnp.allclose(out, ref, atol=2e-2, rtol=2e-2), "bf16 path mismatch vs reference"

    # Exact path: f32 MXU operands, default (large) tile -> single diagonal block.
    out_exact = attention_head(x, wq, wk, wv, mxu_dtype=jnp.float32)
    out_exact = jax.block_until_ready(out_exact)
    assert out_exact.shape == (B, T, H)
    assert jnp.allclose(out_exact, ref, atol=5e-3, rtol=5e-3), "f32 path mismatch vs reference"

    print("KERNEL_OK")
</pallas_src>

<mosaic_0001>
module attributes {stable_mosaic.version = 11 : i64} {
  func.func @_qkv_proj_kernel(%arg0: i32, %arg1: i32, %arg2: memref<1x16x32xf32, #tpu.memory_space<vmem>>, %arg3: memref<32x48xbf16, #tpu.memory_space<vmem>>, %arg4: memref<1x16x16xbf16, #tpu.memory_space<vmem>>, %arg5: memref<1x16x16xbf16, #tpu.memory_space<vmem>>, %arg6: memref<1x16x16xbf16, #tpu.memory_space<vmem>>) attributes {dimension_semantics = [#tpu.dimension_semantics<parallel>, #tpu.dimension_semantics<parallel>], iteration_bounds = array<i64: 2, 4>, scalar_prefetch = 0 : i64, scratch_operands = 0 : i64, tpu.core_type = #tpu.core_type<tc>, window_params = [{transform_indices = @transform_0, window_bounds = array<i64: 1, 16, 32>}, {pipeline_mode = #tpu.pipeline_mode<synchronous>, transform_indices = @transform_1, window_bounds = array<i64: 32, 48>}, {transform_indices = @transform_2, window_bounds = array<i64: 1, 16, 16>}, {transform_indices = @transform_3, window_bounds = array<i64: 1, 16, 16>}, {transform_indices = @transform_4, window_bounds = array<i64: 1, 16, 16>}]} {
    %c0 = arith.constant 0 : index
    %c0_0 = arith.constant 0 : index
    %c0_1 = arith.constant 0 : index
    %0 = vector.load %arg2[%c0, %c0_0, %c0_1] : memref<1x16x32xf32, #tpu.memory_space<vmem>>, vector<1x16x32xf32>
    %1 = vector.shape_cast %0 : vector<1x16x32xf32> to vector<16x32xf32>
    %2 = arith.truncf %1 : vector<16x32xf32> to vector<16x32xbf16>
    %c0_2 = arith.constant 0 : index
    %c0_3 = arith.constant 0 : index
    %3 = vector.load %arg3[%c0_2, %c0_3] : memref<32x48xbf16, #tpu.memory_space<vmem>>, vector<32x48xbf16>
    %cst = arith.constant dense<0.000000e+00> : vector<16x48xf32>
    %4 = tpu.matmul %2, %3, %cst {dimension_numbers = #tpu.dot_dimension_numbers<[1], [0], [0], [1], [0, 0, 1, 1], [], []>} : vector<16x32xbf16>, vector<32x48xbf16>, vector<16x48xf32> -> vector<16x48xf32>
    %cst_4 = arith.constant 3.200000e+01 : f32
    %5 = math.sqrt %cst_4 : f32
    %cst_5 = arith.constant 1.000000e+00 : f32
    %6 = arith.divf %cst_5, %5 : f32
    %7 = vector.extract_strided_slice %4 {offsets = [0, 0], sizes = [16, 16], strides = [1, 1]} : vector<16x48xf32> to vector<16x16xf32>
    %8 = vector.broadcast %6 : f32 to vector<16x16xf32>
    %9 = arith.mulf %7, %8 : vector<16x16xf32>
    %10 = arith.truncf %9 : vector<16x16xf32> to vector<16x16xbf16>
    %c0_6 = arith.constant 0 : index
    %c0_7 = arith.constant 0 : index
    %c0_8 = arith.constant 0 : index
    %11 = vector.load %arg4[%c0_6, %c0_7, %c0_8] : memref<1x16x16xbf16, #tpu.memory_space<vmem>>, vector<1x16x16xbf16>
    %12 = vector.shape_cast %11 : vector<1x16x16xbf16> to vector<16x16xbf16>
    %13 = vector.shape_cast %10 : vector<16x16xbf16> to vector<1x16x16xbf16>
    tpu.vector_store %arg4[%c0_6, %c0_7, %c0_8], %13 {strides = array<i32>} : memref<1x16x16xbf16, #tpu.memory_space<vmem>>, vector<1x16x16xbf16>,
    %14 = vector.extract_strided_slice %4 {offsets = [0, 16], sizes = [16, 16], strides = [1, 1]} : vector<16x48xf32> to vector<16x16xf32>
    %15 = arith.truncf %14 : vector<16x16xf32> to vector<16x16xbf16>
    %c0_9 = arith.constant 0 : index
    %c0_10 = arith.constant 0 : index
    %c0_11 = arith.constant 0 : index
    %16 = vector.load %arg5[%c0_9, %c0_10, %c0_11] : memref<1x16x16xbf16, #tpu.memory_space<vmem>>, vector<1x16x16xbf16>
    %17 = vector.shape_cast %16 : vector<1x16x16xbf16> to vector<16x16xbf16>
    %18 = vector.shape_cast %15 : vector<16x16xbf16> to vector<1x16x16xbf16>
    tpu.vector_store %arg5[%c0_9, %c0_10, %c0_11], %18 {strides = array<i32>} : memref<1x16x16xbf16, #tpu.memory_space<vmem>>, vector<1x16x16xbf16>,
    %19 = vector.extract_strided_slice %4 {offsets = [0, 32], sizes = [16, 16], strides = [1, 1]} : vector<16x48xf32> to vector<16x16xf32>
    %20 = arith.truncf %19 : vector<16x16xf32> to vector<16x16xbf16>
    %c0_12 = arith.constant 0 : index
    %c0_13 = arith.constant 0 : index
    %c0_14 = arith.constant 0 : index
    %21 = vector.load %arg6[%c0_12, %c0_13, %c0_14] : memref<1x16x16xbf16, #tpu.memory_space<vmem>>, vector<1x16x16xbf16>
    %22 = vector.shape_cast %21 : vector<1x16x16xbf16> to vector<16x16xbf16>
    %23 = vector.shape_cast %20 : vector<16x16xbf16> to vector<1x16x16xbf16>
    tpu.vector_store %arg6[%c0_12, %c0_13, %c0_14], %23 {strides = array<i32>} : memref<1x16x16xbf16, #tpu.memory_space<vmem>>, vector<1x16x16xbf16>,
    return
  }
  func.func @transform_0(%arg0: i32, %arg1: i32) -> (i32, i32, i32) {
    %c0_i32 = arith.constant 0 : i32
    %c0_i32_0 = arith.constant 0 : i32
    return %arg0, %arg1, %c0_i32 : i32, i32, i32
  }
  func.func @transform_1(%arg0: i32, %arg1: i32) -> (i32, i32) {
    %c0_i32 = arith.constant 0 : i32
    %c0_i32_0 = arith.constant 0 : i32
    %c0_i32_1 = arith.constant 0 : i32
    return %c0_i32, %c0_i32_0 : i32, i32
  }
  func.func @transform_2(%arg0: i32, %arg1: i32) -> (i32, i32, i32) {
    %c0_i32 = arith.constant 0 : i32
    %c0_i32_0 = arith.constant 0 : i32
    return %arg0, %arg1, %c0_i32 : i32, i32, i32
  }
  func.func @transform_3(%arg0: i32, %arg1: i32) -> (i32, i32, i32) {
    %c0_i32 = arith.constant 0 : i32
    %c0_i32_0 = arith.constant 0 : i32
    return %arg0, %arg1, %c0_i32 : i32, i32, i32
  }
  func.func @transform_4(%arg0: i32, %arg1: i32) -> (i32, i32, i32) {
    %c0_i32 = arith.constant 0 : i32
    %c0_i32_0 = arith.constant 0 : i32
    return %arg0, %arg1, %c0_i32 : i32, i32, i32
  }
}

</mosaic_0001>

<bundles_post_ra>
// kernel: tpu_custom_call.1
= control target key start
LH: loop header
LB: loop body
LE: loop exit
PB: predicated region body
PF: predicated region fallthrough
CT: control target
= control target key end

     0   :  { %s730_s15 = smov 0   ;;  %s732_s16 = smov 0   ;;  %s799_s0 = inlined_call_operand.vmem [shape: f32[2,64,32], index: 0, kind: input, shape index: {}]   ;;  %s800_s1 = inlined_call_operand.vmem [shape: bf16[32,48], index: 1, kind: input, shape index: {}]   ;;  %s801_s2 = inlined_call_operand.vmem [shape: bf16[2,64,16], index: 2, kind: output, shape index: {0}]   ;;  %s802_s3 = inlined_call_operand.vmem [shape: bf16[2,64,16], index: 3, kind: output, shape index: {1}]   ;;  %s803_s4 = inlined_call_operand.vmem [shape: bf16[2,64,16], index: 4, kind: output, shape index: {2}]  }
   0x1   :  { %s734_s17 = smov 0   ;;  %s736_s18 = smov 0  }
   0x2   :  { %s738_s19 = smov 0  }
   0x3 LB: > { %s24_s20 = sadd.s32 1, %s691_s17  ;;  %s27_s21 = sadd.s32 1, %s695_s18  ;;  %s699_s19 = sphi %s738_s19, %s15_s19   ;;  %s695_s18 = sphi %s736_s18, %s807_s18   ;;  %s691_s17 = sphi %s734_s17, %s806_s17   ;;  %s687_s16 = sphi %s732_s16, %s805_s16   ;;  %s683_s15 = sphi %s730_s15, %s804_s15  }
   0x4   : > { %p25_p0 = scmp.ge.s32.totalorder %s24_s20, 4  ;;  %p578_p1 = scmp.ge.s32.totalorder %s699_s19, 1 }
   0x5   : > { %p192_p2 = scmp.lt.s32.totalorder %s699_s19, 9 }
   0x6   : > { %s809_s20 = smov (%p25_p0, %s24_s20), 0  ;;  %s811_s21 = smov (!%p25_p0, %s27_s21), %s695_s18 }
   0x7   : > { %p193_p3 = pnand %p578_p1, %p192_p2  ;;  %p29_p4 = scmp.ge.s32.totalorder %s811_s21, 2 }
   0x8   : > { %v659_v0 = vld [vmem:[%s800_s1] sm:$0xff] (!%p193_p3)   ;;  %v701_v1 = vmov (!%p193_p3), 0.0   ;;  %v660_v2 = vld [vmem:[%s800_s1 + $0x8] sm:$0xff] (!%p193_p3)   ;;  %vm702_vm0 = vmmov (!%p193_p3), 0   ;;  %s579_s26 = sshll.u32 (!%p193_p3), %s683_s15, 1  ;;  %p245_p5 = scmp.lt.s32.totalorder (!%p193_p3), %s687_s16, 1 }
   0x9   : > { %s813_s21 = smov (%p29_p4, %s811_s21), 0  ;;  %196 = sbr.rel (%p193_p3) target bundleno = 358 (0x166), region = 28 }
   0xa   : > { %607 = vmatprep.subr.bf16.mxu0 (!%p193_p3), %v701_v1  ;;  %611 = vmatprep.mubr.msk.bf16.mxu0 (!%p193_p3), %vm702_vm0, %v701_v1  ;;  %p247_p6 = scmp.lt.s32.totalorder (!%p193_p3), %s579_s26, 7  ;;  %vm304_vm1 = vcmask (!%p193_p3), 261120   ;;  %vm359_vm2 = vcmask (!%p193_p3), 125952   ;;  %s703_s11 = smov (!%p193_p3), 96  }
   0xb   : > { %608 = vmatpush3.bf16.msra.mxu0 (!%p193_p3), %v659_v0  ;;  %s704_s12 = smov (!%p193_p3), 112  }
   0xc   : > { %609 = vmatprep.subr.bf16.mxu0 (!%p193_p3), %v701_v1 }
   0xf   : > { %610 = vmatpush3.bf16.msra.mxu0 (!%p193_p3), %v660_v2 }
  0x10   : > { %s815_s16 = smov (!%p245_p5, %s687_s16), 1  ;;  %s817_s26 = smov (!%p247_p6, %s579_s26), 7 }
  0x11   : > { %s580_s27 = sshll.u32 %s815_s16, 3 }
  0x12   : > { %s250_s28 = sadd.s32 %s580_s27, %s817_s26 }
  0x13   : > { %s581_s29 = sshll.u32 %s250_s28, 3  ;;  %s584_s7 = sshll.u32 %s250_s28, 2 }
  0x14   : > { %s252_s6 = scalar_lea.vmem %s799_s0, %s581_s29  ;;  %s262_s10 = scalar_lea.vmem %s801_s2, %s584_s7 }
  0x15   : > { %v285_v3 = vld [vmem:[%s252_s6] sm:$0xff]  ;;  %v286_v4 = vld [vmem:[%s252_s6 + $0x8] sm:$0xff]  ;;  %s282_s15 = scalar_lea.vmem %s803_s4, %s584_s7  ;;  %s272_s23 = scalar_lea.vmem %s802_s3, %s584_s7 }
  0x16   : > { %v287_v5 = vpack.c.bf16 %v286_v4, %v285_v3 }
  0x18   : > { %612 = vmatmul.mubr.msk.bf16.vlgmr.msra.gmra.mrb[0].mxu0 %vm304_vm1, %v287_v5 }
  0xeb   : > { %v342_v6 = vpop.f32.mrb[0].mxu0 }
  0xec   : > { %v349_v7 = vmul.f32 0.17677669, %v342_v6  ;;  %v613_v8 = vpop.f32.mrb[1].mxu0  ;;  %v602_v9 = vpack.c.bf16 %v342_v6, %v342_v6 }
  0xed   : > { %v345_v10 = vpop.f32.mrb[2].mxu0 }
  0xee   : > { %v600_v11 = vpack.c.bf16 %v349_v7, %v349_v7  ;;  %v350_v12 = vmul.f32 0.17677669, %v345_v10  ;;  %376 = vrot.lane.b32.xlu1 %v602_v9, %s703_s11  ;;  %368 = vrot.lane.b32.xlu0 %v602_v9, %s704_s12  ;;  %v614_v13 = vpop.f32.mrb[3].mxu0  ;;  %v603_v15 = vpack.c.bf16 %v345_v10, %v345_v10 }
  0xf0   : > { %v601_v14 = vpack.c.bf16 %v350_v12, %v350_v12  ;;  %360 = vst.msk [vmem:[%s262_s10] sm:$0xf] %vm359_vm2, %v600_v11 }
  0xf2   : > { %378 = vrot.lane.b32.xlu1 %v603_v15, %s703_s11  ;;  %370 = vrot.lane.b32.xlu0 %v603_v15, %s704_s12  ;;  %361 = vst.msk [vmem:[%s262_s10 + $0x4] sm:$0xf] %vm359_vm2, %v601_v14 }
 0x160   : > { %v377_v16 = vpop.permute.xlu1 %376  ;;  %v369_v17 = vpop.permute.xlu0 %368 }
 0x161   : > { %382 = vst.msk [vmem:[%s282_s15] sm:$0xf] %vm359_vm2, %v377_v16  ;;  %374 = vst.msk [vmem:[%s272_s23] sm:$0xf] %vm359_vm2, %v369_v17 }
 0x164   : > { %v379_v18 = vpop.permute.xlu1 %378  ;;  %v371_v19 = vpop.permute.xlu0 %370 }
 0x165   : > { %383 = vst.msk [vmem:[%s282_s15 + $0x4] sm:$0xf] %vm359_vm2, %v379_v18  ;;  %375 = vst.msk [vmem:[%s272_s23 + $0x4] sm:$0xf] %vm359_vm2, %v371_v19 }
 0x166 PF: > { %s15_s19 = sadd.s32 1, %s699_s19   ;;  %s804_s15 = smov %s691_s17 }
 0x167   : > { %p12_p7 = scmp.ge.s32.totalorder %s15_s19, 10   ;;  %s805_s16 = smov %s695_s18 }
 0x168   : > { %s806_s17 = smov %s809_s20  ;;  %s807_s18 = smov %s813_s21 }
 0x169   :  { %14 = sbr.rel (!%p12_p7) target bundleno = 3 (0x3), region = 82 }

</bundles_post_ra>
